<compile_context>
chip_gen: v7x
topology: tpu7x:2x2x1
jax: 0.10.0
libtpu: 0.0.40
codegen_flags: <defaults>
</compile_context>

<pallas_src>
import jax
import jax.numpy as jnp
from jax.experimental import pallas as pl
from jax.experimental.pallas import tpu as pltpu


def _round_up(x: int, m: int) -> int:
    return ((x + m - 1) // m) * m


def _sublane_granule(dtype) -> int:
    # Sub-32-bit dtypes pack along sublanes: 8 rows for f32, 16 for bf16, 32 for 8-bit.
    return max(8, 32 // jnp.dtype(dtype).itemsize)


def _rwf_linear_kernel(x_ref, v_ref, sb_ref, o_ref):
    """One (tm, tn) output tile; K is the sequential (last) grid axis.

    x_ref : (tm, tk)  compute dtype (bf16 by default)
    v_ref : (tk, tn)  compute dtype; weight pre-transposed to (in, out), K-major
    sb_ref: (2, tn)   f32; row 0 = s, row 1 = bias
    o_ref : (tm, tn)  f32 output tile; doubles as the accumulator since its
                      block index is K-invariant (VMEM-resident across K).
    """
    k = pl.program_id(2)

    @pl.when(k == 0)
    def _():
        o_ref[...] = jnp.zeros_like(o_ref)

    # MXU matmul with f32 accumulation directly into the resident output tile.
    o_ref[...] += jnp.dot(
        x_ref[...], v_ref[...], preferred_element_type=jnp.float32
    )

    @pl.when(k == pl.num_programs(2) - 1)
    def _():
        # Epilogue runs once per output tile:
        #   y = (x @ V.T) * exp(s) + bias == x @ (exp(s)[:, None] * V).T + bias
        scale = jnp.exp(sb_ref[0:1, :])   # (1, tn), f32 on the EUP
        bias = sb_ref[1:2, :]             # (1, tn), f32
        o_ref[...] = o_ref[...] * scale + bias


def prepare_rwf_weights(V, s, bias, *, tn: int = 512, tk: int = 1024,
                        compute_dtype=jnp.bfloat16):
    """One-time weight preprocessing. Do NOT call per forward step.

    Transposes V to (in, out) (no in-kernel transpose / XLU traffic, OUT on
    lanes), zero-pads K/N to tile multiples, casts to the MXU compute dtype,
    and packs s/bias into a single (2, Np) f32 array.
    """
    out_features, in_features = V.shape
    assert s.shape == (out_features,)
    assert bias.shape == (out_features,)

    n_aligned = _round_up(out_features, 128)   # lane granule
    tn = min(tn, n_aligned)
    # Megacore (v7x): prefer >= 2 N blocks so the second TensorCore has work
    # even when the batch fits a single M block. No-op for large out_features.
    if n_aligned // tn < 2 and n_aligned >= 256:
        tn = _round_up((n_aligned + 1) // 2, 128)
    tk = min(tk, _round_up(in_features, 128))

    Np = _round_up(out_features, tn)
    Kp = _round_up(in_features, tk)

    v_p = jnp.pad(
        V.T.astype(compute_dtype),
        ((0, Kp - in_features), (0, Np - out_features)),
    )
    sb = jnp.stack([s.astype(jnp.float32), bias.astype(jnp.float32)])  # (2, out)
    sb_p = jnp.pad(sb, ((0, 0), (0, Np - out_features)))

    cfg = dict(
        in_features=in_features,
        out_features=out_features,
        tn=tn, tk=tk, Np=Np, Kp=Kp,
        compute_dtype=jnp.dtype(compute_dtype),
    )
    return v_p, sb_p, cfg


def rwf_linear(x, v_p, sb_p, cfg, *, tm: int = 512):
    """y = x @ (exp(s)[:, None] * V).T + bias with pre-prepared weights."""
    batch, in_features = x.shape
    assert in_features == cfg["in_features"]
    out_features = cfg["out_features"]
    tn, tk, Np, Kp = cfg["tn"], cfg["tk"], cfg["Np"], cfg["Kp"]
    compute_dtype = cfg["compute_dtype"]
    itemsize = compute_dtype.itemsize

    # Dtype-aware sublane clamp (8 f32 / 16 bf16 / 32 int8-fp8).
    tm = min(tm, _round_up(batch, _sublane_granule(compute_dtype)))
    Mp = _round_up(batch, tm)

    # Only x needs per-call padding (M and K); skip when already aligned.
    x_c = x.astype(compute_dtype)
    if (Mp, Kp) != (batch, in_features):
        x_c = jnp.pad(x_c, ((0, Mp - batch), (0, Kp - in_features)))

    grid = (Mp // tm, Np // tn, Kp // tk)

    cost = pl.CostEstimate(
        flops=2 * Mp * Np * Kp,
        transcendentals=(Mp // tm) * Np,   # exp(s) once per (i, j) output tile
        bytes_accessed=(Mp * Kp + Kp * Np) * itemsize + 2 * Np * 4 + Mp * Np * 4,
    )

    # Double-buffered x / V / sb inputs + the K-resident f32 output tile.
    vmem_est = (2 * (tm * tk + tk * tn) * itemsize
                + 2 * 2 * tn * 4
                + 2 * tm * tn * 4)
    vmem_limit = int(min(max(vmem_est * 5 // 4, 32 * 1024 * 1024),
                         56 * 1024 * 1024))

    out_p = pl.pallas_call(
        _rwf_linear_kernel,
        out_shape=jax.ShapeDtypeStruct((Mp, Np), jnp.float32),
        grid=grid,
        in_specs=[
            pl.BlockSpec((tm, tk), lambda i, j, k: (i, k)),   # x tile
            pl.BlockSpec((tk, tn), lambda i, j, k: (k, j)),   # V.T tile (K-major)
            pl.BlockSpec((2, tn), lambda i, j, k: (0, j)),    # [s; bias] slice
        ],
        out_specs=pl.BlockSpec((tm, tn), lambda i, j, k: (i, j)),
        compiler_params=pltpu.CompilerParams(
            dimension_semantics=("parallel", "parallel", "arbitrary"),
            vmem_limit_bytes=vmem_limit,
        ),
        cost_estimate=cost,
    )(x_c, v_p, sb_p)

    if (Mp, Np) != (batch, out_features):
        out_p = out_p[:batch, :out_features]
    return out_p


def init_params(key, in_features: int, out_features: int,
                mu: float = 1.0, sigma: float = 0.1):
    """Deterministic re-implementation of the module's __init__."""
    k_s, k_v, k_b = jax.random.split(key, 3)
    s = jax.random.normal(k_s, (out_features,), jnp.float32) * sigma + mu
    xavier_std = (2.0 / (in_features + out_features)) ** 0.5
    V = jax.random.normal(k_v, (out_features, in_features), jnp.float32) * xavier_std
    bias = jax.random.normal(k_b, (out_features,), jnp.float32)
    return V, s, bias


if __name__ == "__main__":
    key = jax.random.PRNGKey(0)
    k_x, k_p = jax.random.split(key)

    batch, in_features, out_features = 8, 32, 64
    x = jax.random.normal(k_x, (batch, in_features), jnp.float32)
    V, s, bias = init_params(k_p, in_features, out_features)

    # Pure-JAX reference of the module semantics.
    y_ref = x @ (jnp.exp(s)[:, None] * V).T + bias

    # f32 operand path: should match the reference tightly.
    v32, sb32, cfg32 = prepare_rwf_weights(V, s, bias, compute_dtype=jnp.float32)
    y32 = jax.block_until_ready(rwf_linear(x, v32, sb32, cfg32))
    assert y32.shape == (batch, out_features)
    assert jnp.allclose(y32, y_ref, atol=1e-5, rtol=1e-5)

    # bf16 MXU-operand path (f32 accumulation + f32 epilogue) -- perf default.
    vbf, sbbf, cfgbf = prepare_rwf_weights(V, s, bias, compute_dtype=jnp.bfloat16)
    ybf = jax.block_until_ready(rwf_linear(x, vbf, sbbf, cfgbf))
    assert ybf.shape == (batch, out_features)
    assert jnp.allclose(ybf, y_ref, atol=1e-1, rtol=5e-2)

    print("KERNEL_OK")
</pallas_src>

<mosaic_0001>
module attributes {stable_mosaic.version = 11 : i64} {
  func.func @_rwf_linear_kernel(%arg0: i32, %arg1: i32, %arg2: i32, %arg3: memref<8x128xf32, #tpu.memory_space<vmem>>, %arg4: memref<128x128xf32, #tpu.memory_space<vmem>>, %arg5: memref<2x128xf32, #tpu.memory_space<vmem>>, %arg6: memref<8x128xf32, #tpu.memory_space<vmem>>) attributes {dimension_semantics = [#tpu.dimension_semantics<parallel>, #tpu.dimension_semantics<parallel>, #tpu.dimension_semantics<arbitrary>], iteration_bounds = array<i64: 1, 1, 1>, scalar_prefetch = 0 : i64, scratch_operands = 0 : i64, tpu.core_type = #tpu.core_type<tc>, window_params = [{transform_indices = @transform_0, window_bounds = array<i64: 8, 128>}, {transform_indices = @transform_1, window_bounds = array<i64: 128, 128>}, {transform_indices = @transform_2, window_bounds = array<i64: 2, 128>}, {transform_indices = @transform_3, window_bounds = array<i64: 8, 128>}]} {
    %c0_i32 = arith.constant 0 : i32
    %0 = arith.cmpi eq, %arg2, %c0_i32 : i32
    %1 = arith.extui %0 : i1 to i32
    %c0_i32_0 = arith.constant 0 : i32
    %2 = arith.cmpi ne, %1, %c0_i32_0 : i32
    scf.if %2 {
      %cst_10 = arith.constant 0.000000e+00 : f32
      %12 = vector.broadcast %cst_10 : f32 to vector<8x128xf32>
      %c0_11 = arith.constant 0 : index
      %c0_12 = arith.constant 0 : index
      %13 = vector.load %arg6[%c0_11, %c0_12] : memref<8x128xf32, #tpu.memory_space<vmem>>, vector<8x128xf32>
      tpu.vector_store %arg6[%c0_11, %c0_12], %12 {strides = array<i32>} : memref<8x128xf32, #tpu.memory_space<vmem>>, vector<8x128xf32>,
    } else {
    }
    %c0 = arith.constant 0 : index
    %c0_1 = arith.constant 0 : index
    %3 = vector.load %arg6[%c0, %c0_1] : memref<8x128xf32, #tpu.memory_space<vmem>>, vector<8x128xf32>
    %c0_2 = arith.constant 0 : index
    %c0_3 = arith.constant 0 : index
    %4 = vector.load %arg3[%c0_2, %c0_3] : memref<8x128xf32, #tpu.memory_space<vmem>>, vector<8x128xf32>
    %c0_4 = arith.constant 0 : index
    %c0_5 = arith.constant 0 : index
    %5 = vector.load %arg4[%c0_4, %c0_5] : memref<128x128xf32, #tpu.memory_space<vmem>>, vector<128x128xf32>
    %cst = arith.constant dense<0.000000e+00> : vector<8x128xf32>
    %6 = tpu.matmul %4, %5, %cst {dimension_numbers = #tpu.dot_dimension_numbers<[1], [0], [0], [1], [0, 0, 1, 1], [], []>} : vector<8x128xf32>, vector<128x128xf32>, vector<8x128xf32> -> vector<8x128xf32>
    %7 = arith.addf %3, %6 : vector<8x128xf32>
    %c0_6 = arith.constant 0 : index
    %c0_7 = arith.constant 0 : index
    %8 = vector.load %arg6[%c0_6, %c0_7] : memref<8x128xf32, #tpu.memory_space<vmem>>, vector<8x128xf32>
    tpu.vector_store %arg6[%c0_6, %c0_7], %7 {strides = array<i32>} : memref<8x128xf32, #tpu.memory_space<vmem>>, vector<8x128xf32>,
    %c0_i32_8 = arith.constant 0 : i32
    %9 = arith.cmpi eq, %arg2, %c0_i32_8 : i32
    %10 = arith.extui %9 : i1 to i32
    %c0_i32_9 = arith.constant 0 : i32
    %11 = arith.cmpi ne, %10, %c0_i32_9 : i32
    scf.if %11 {
      %c0_10 = arith.constant 0 : index
      %c0_11 = arith.constant 0 : index
      %12 = vector.load %arg5[%c0_10, %c0_11] : memref<2x128xf32, #tpu.memory_space<vmem>>, vector<1x128xf32>
      %13 = math.exp %12 : vector<1x128xf32>
      %c1 = arith.constant 1 : index
      %c0_12 = arith.constant 0 : index
      %14 = vector.load %arg5[%c1, %c0_12] : memref<2x128xf32, #tpu.memory_space<vmem>>, vector<1x128xf32>
      %c0_13 = arith.constant 0 : index
      %c0_14 = arith.constant 0 : index
      %15 = vector.load %arg6[%c0_13, %c0_14] : memref<8x128xf32, #tpu.memory_space<vmem>>, vector<8x128xf32>
      %16 = vector.broadcast %13 : vector<1x128xf32> to vector<8x128xf32>
      %17 = arith.mulf %15, %16 : vector<8x128xf32>
      %18 = vector.broadcast %14 : vector<1x128xf32> to vector<8x128xf32>
      %19 = arith.addf %17, %18 : vector<8x128xf32>
      %c0_15 = arith.constant 0 : index
      %c0_16 = arith.constant 0 : index
      %20 = vector.load %arg6[%c0_15, %c0_16] : memref<8x128xf32, #tpu.memory_space<vmem>>, vector<8x128xf32>
      tpu.vector_store %arg6[%c0_15, %c0_16], %19 {strides = array<i32>} : memref<8x128xf32, #tpu.memory_space<vmem>>, vector<8x128xf32>,
    } else {
    }
    return
  }
  func.func @transform_0(%arg0: i32, %arg1: i32, %arg2: i32) -> (i32, i32) {
    %c0_i32 = arith.constant 0 : i32
    return %arg0, %arg2 : i32, i32
  }
  func.func @transform_1(%arg0: i32, %arg1: i32, %arg2: i32) -> (i32, i32) {
    %c0_i32 = arith.constant 0 : i32
    return %arg2, %arg1 : i32, i32
  }
  func.func @transform_2(%arg0: i32, %arg1: i32, %arg2: i32) -> (i32, i32) {
    %c0_i32 = arith.constant 0 : i32
    %c0_i32_0 = arith.constant 0 : i32
    return %c0_i32, %arg1 : i32, i32
  }
  func.func @transform_3(%arg0: i32, %arg1: i32, %arg2: i32) -> (i32, i32) {
    %c0_i32 = arith.constant 0 : i32
    return %arg0, %arg1 : i32, i32
  }
}

</mosaic_0001>

<bundles_post_ra>
// kernel: tpu_custom_call.1
= control target key start
LH: loop header
LB: loop body
LE: loop exit
PB: predicated region body
PF: predicated region fallthrough
CT: control target
= control target key end

     0   :  { %8 = vsyncpa [#allocation3], 0  ;;  %s407_s0 = inlined_call_operand.hbm [shape: f32[8,128], index: 0, kind: input, shape index: {}]   ;;  %s408_s1 = inlined_call_operand.hbm [shape: f32[128,128], index: 1, kind: input, shape index: {}]   ;;  %s409_s2 = inlined_call_operand.vmem [shape: f32[2,128], index: 2, kind: input, shape index: {}]   ;;  %s410_s3 = inlined_call_operand.hbm [shape: f32[8,128], index: 3, kind: output, shape index: {}]  }
   0x1   :  { %9 = vsyncpa [#allocation6], 0 }
   0x2   :  { %10 = vsyncpa [#allocation4], 0  ;;  %s330_s12 = smov [#allocation2]   ;;  %s331_s14 = smov [#allocation5]  }
   0x3   :  { %s17_s13 = sshll.u32 %s330_s12, 4  ;;  %s26_s15 = sshll.u32 %s331_s14, 4  ;;  %s18_s13 = int_to_ptr.vmem [resolvable:$true] %s17_s13  ;;  %s358_s15 = int_to_ptr.vmem [resolvable:$true] %s26_s15 }
   0x4   :  { %s258_s18 = scalar_lea.hbm %s407_s0, 128 }
   0x5   :  { %p259_p0 = scmp.ne.s32.totalorder %s407_s0, %s258_s18  ;;  %p262_p1 = scmp.lt.u32.totalorder %s258_s18, %s407_s0 }
   0x7   :  { %p264_p2 = pnand %p262_p1, %p259_p0 }
   0x9   :  { %267 = shalt.err (!%p264_p2)
}
   0xa   :  { %s268_s23 = scalar_lea.vmem %s18_s13, 128  ;;  %p273_p4 = scmp.lt.s32.totalorder %s18_s13, %s18_s13 }
   0xb   :  { %p269_p3 = scmp.ne.s32.totalorder %s18_s13, %s268_s23  ;;  %p274_p5 = scmp.lt.s32.totalorder %s268_s23, %s268_s23 }
   0xd   :  { %p275_p6 = por %p274_p5, %p273_p4 }
   0xf   :  { %p276_p7 = pnand %p275_p6, %p269_p3 }
  0x11   :  { %279 = shalt.err (!%p276_p7)
}
  0x12   :  { %20 = dma.hbm_to_vmem [thread:$0]  %s407_s0, 128, %s18_s13, [#allocation3]  }
  0x13   :  { %s280_s28 = scalar_lea.hbm %s408_s1, 2048 }
  0x14   :  { %p281_p8 = scmp.ne.s32.totalorder %s408_s1, %s280_s28  ;;  %p284_p9 = scmp.lt.u32.totalorder %s280_s28, %s408_s1 }
  0x16   :  { %p286_p10 = pnand %p284_p9, %p281_p8 }
  0x18   :  { %289 = shalt.err (!%p286_p10)
}
  0x19   :  { %s290_s6 = scalar_lea.vmem %s358_s15, 2048  ;;  %p295_p12 = scmp.lt.s32.totalorder %s358_s15, %s358_s15 }
  0x1a   :  { %p291_p11 = scmp.ne.s32.totalorder %s358_s15, %s290_s6  ;;  %p296_p13 = scmp.lt.s32.totalorder %s290_s6, %s290_s6 }
  0x1c   :  { %p297_p0 = por %p296_p13, %p295_p12 }
  0x1e   :  { %p298_p1 = pnand %p297_p0, %p291_p11 }
  0x20   :  { %301 = shalt.err (!%p298_p1)
}
  0x21   :  { %s332_s0 = smov 128   ;;  %s333_s7 = smov 8  }
  0x22   :  { %32 = dma.hbm_to_vmem [thread:$0]  %s408_s1, 2048, %s358_s15, [#allocation6], %s332_s0, %s332_s0, %s333_s7  }
  0x23   :  { %324 = dma.done.wait [#allocation3], 128  }
  0x24   :  { %325 = vsyncadd [#allocation3], 4294967168 }
  0x25   :  { %326 = dma.done.wait [#allocation6], 2048  }
  0x26   :  { %327 = vsyncadd [#allocation6], 4294965248  ;;  %v334_v0 = vmov 0.0|0.0   ;;  %vm335_vm0 = vmmov 0   ;;  %v336_v1 = vmov 0.0   ;;  %v48_v2 = vld [vmem:[#allocation5] sm:$0xff]  ;;  %v144_v29 = vlaneseq }
  0x27   :  { %224 = vmatprep.subr.bf16.mxu0 %v334_v0  ;;  %221 = vmatprep.mubr.msk.f32.mxu0 %vm335_vm0, %v336_v1  ;;  %v49_v3 = vld [vmem:[#allocation5 + $0x8] sm:$0xff]  ;;  %v50_v4 = vld [vmem:[#allocation5 + $0x10] sm:$0xff]  ;;  %v51_v6 = vld [vmem:[#allocation5 + $0x18] sm:$0xff]  ;;  %s337_s13 = smov [#allocation7]  }
  0x28   :  { %v225_v5 = vpack.c.bf16 %v49_v3, %v48_v2  ;;  %v228_v7 = vpack.c.bf16 %v51_v6, %v50_v4  ;;  %v52_v8 = vld [vmem:[#allocation5 + $0x20] sm:$0xff]  ;;  %v53_v9 = vld [vmem:[#allocation5 + $0x28] sm:$0xff]  ;;  %v54_v11 = vld [vmem:[#allocation5 + $0x30] sm:$0xff]  ;;  %v145_v30 = vshrl.u32 %v144_v29, 7  ;;  %s161_s14 = sshll.u32 %s337_s13, 4  ;;  %s162_s14 = int_to_ptr.vmem [resolvable:$true] %s161_s14 }
  0x29   :  { %v231_v10 = vpack.c.bf16 %v53_v9, %v52_v8  ;;  %v55_v12 = vld [vmem:[#allocation5 + $0x38] sm:$0xff]  ;;  %v56_v14 = vld [vmem:[#allocation5 + $0x40] sm:$0xff]  ;;  %v57_v15 = vld [vmem:[#allocation5 + $0x48] sm:$0xff]  ;;  %s302_s15 = scalar_lea.vmem %s162_s14, 128  ;;  %p307_p3 = scmp.lt.s32.totalorder %s162_s14, %s162_s14 }
  0x2a   :  { %226 = vmatpush3.bf16.msra.mxu0 %v225_v5  ;;  %v234_v13 = vpack.c.bf16 %v55_v12, %v54_v11  ;;  %v237_v16 = vpack.c.bf16 %v57_v15, %v56_v14  ;;  %v58_v17 = vld [vmem:[#allocation5 + $0x50] sm:$0xff]  ;;  %v59_v18 = vld [vmem:[#allocation5 + $0x58] sm:$0xff]  ;;  %v60_v20 = vld [vmem:[#allocation5 + $0x60] sm:$0xff]  ;;  %v146_v31 = vsub.s32 0, %v145_v30  ;;  %p303_p2 = scmp.ne.s32.totalorder %s162_s14, %s302_s15  ;;  %p308_p4 = scmp.lt.s32.totalorder %s302_s15, %s302_s15 }
  0x2b   :  { %227 = vmatprep.subr.bf16.mxu0 %v334_v0  ;;  %v240_v19 = vpack.c.bf16 %v59_v18, %v58_v17  ;;  %v61_v21 = vld [vmem:[#allocation5 + $0x68] sm:$0xff]  ;;  %v62_v23 = vld [vmem:[#allocation5 + $0x70] sm:$0xff]  ;;  %v63_v24 = vld [vmem:[#allocation5 + $0x78] sm:$0xff] }
  0x2c   :  { %v243_v22 = vpack.c.bf16 %v61_v21, %v60_v20  ;;  %v246_v25 = vpack.c.bf16 %v63_v24, %v62_v23  ;;  %v47_v26 = vld [vmem:[#allocation2] sm:$0xff]  ;;  %p309_p5 = por %p308_p4, %p307_p3 }
  0x2d   :  { %v139_v27 = vld [vmem:[%s409_s2] sm:$0x1]  ;;  %v171_v36 = vld [vmem:[%s409_s2 + $0x1] ss:$0 sm:$0xff] }
  0x2e   :  { %229 = vmatpush3.bf16.msra.mxu0 %v228_v7  ;;  %v140_v28 = vmul.f32 1.442695, %v139_v27  ;;  %p310_p6 = pnand %p309_p5, %p303_p2 }
  0x2f   :  { %230 = vmatprep.subr.bf16.mxu0 %v334_v0 }
  0x30   :  { %256 = vpow2.f32 %v140_v28 }
  0x32   :  { %232 = vmatpush3.bf16.msra.mxu0 %v231_v10 }
  0x33   :  { %233 = vmatprep.subr.bf16.mxu0 %v334_v0 }
  0x36   :  { %235 = vmatpush3.bf16.msra.mxu0 %v234_v13 }
  0x37   :  { %236 = vmatprep.subr.bf16.mxu0 %v334_v0 }
  0x3a   :  { %238 = vmatpush3.bf16.msra.mxu0 %v237_v16  ;;  %v257_v32 = vpop.eup %256 }
  0x3b   :  { %239 = vmatprep.subr.bf16.mxu0 %v334_v0  ;;  %v147_v33 = vrot.slane %v257_v32, %v146_v31 }
  0x3e   :  { %241 = vmatpush3.bf16.msra.mxu0 %v240_v19 }
  0x3f   :  { %242 = vmatprep.subr.bf16.mxu0 %v334_v0 }
  0x42   :  { %244 = vmatpush3.bf16.msra.mxu0 %v243_v22 }
  0x43   :  { %245 = vmatprep.subr.bf16.mxu0 %v334_v0 }
  0x46   :  { %247 = vmatpush3.bf16.msra.mxu0 %v246_v25 }
  0x49   :  { %222 = vmatmul.mubr.f32.vlgmr.msra.gmra.mrb[0].mxu0 %v47_v26 }
 0x11c   :  { %v130_v34 = vpop.f32.mrb[0].mxu0 }
 0x11d   :  { %v223_v35 = vpop.f32.mrb[1].mxu0  ;;  %v148_v37 = vmul.f32 %v147_v33, %v130_v34 }
 0x11f   :  { %v153_v38 = vadd.f32 %v171_v36, %v148_v37 }
 0x121   :  { %154 = vst [vmem:[#allocation7] sm:$0xff] %v153_v38 }
 0x122   :  { %313 = shalt.err (!%p310_p6)
}
 0x123   :  { %s314_s18 = scalar_lea.hbm %s410_s3, 128 }
 0x124   :  { %p315_p7 = scmp.ne.s32.totalorder %s410_s3, %s314_s18  ;;  %p318_p8 = scmp.lt.u32.totalorder %s314_s18, %s410_s3 }
 0x126   :  { %p320_p9 = pnand %p318_p8, %p315_p7 }
 0x128   :  { %323 = shalt.err (!%p320_p9)
}
 0x129   :  { %164 = dma.vmem_to_hbm [thread:$0]  %s162_s14, 128, %s410_s3, [#allocation4]  }
 0x12a   :  { %328 = dma.done.wait [#allocation4], 128  }
 0x12b   :  { %329 = vsyncadd [#allocation4], 4294967168 }
 0x12c   :  { %168 = vsyncpa [#allocation3], 1 }
 0x12d   :  { %169 = vsyncpa [#allocation6], 1 }
 0x12e   :  { %170 = vsyncpa [#allocation4], 1 }

</bundles_post_ra>
